<compile_context>
chip_gen: v7x
topology: tpu7x:2x2x1
jax: 0.10.0
libtpu: 0.0.40
codegen_flags: <defaults>
</compile_context>

<pallas_src>
import jax
import jax.numpy as jnp
from jax.experimental import pallas as pl
from jax.experimental.pallas import tpu as pltpu

# ---- model hyper-parameters (d2l-style defaults for the global dropout1/2) ----
NUM_INPUTS   = 256
NUM_HIDDENS1 = 128
NUM_HIDDENS2 = 64
NUM_OUTPUTS  = 16
OUT_PAD      = 128          # lane-dense padded logits width (multiple of 128)

DROPOUT1 = 0.2
DROPOUT2 = 0.5
TRAINING = True

# keep element iff its uint32 random bits exceed round(p * 2^32)
_THRESH1 = min(int(round(DROPOUT1 * 2 ** 32)), 2 ** 32 - 1)
_THRESH2 = min(int(round(DROPOUT2 * 2 ** 32)), 2 ** 32 - 1)


def mlp_dropout_kernel(x_ref, bits_ref,
                       w1_ref, b1_ref,
                       w2_ref, b2_ref,
                       w3_ref, b3_ref,
                       out_ref):
    x = x_ref[...]

    # ---- layer 1: linear (bf16 MXU inputs, f32 accumulate) + relu + dropout(p1)
    h1 = jnp.dot(x.astype(jnp.bfloat16), w1_ref[...],
                 preferred_element_type=jnp.float32) + b1_ref[...]
    h1 = jnp.maximum(h1, 0.0)
    if TRAINING and DROPOUT1 >= 1.0:
        h1 = jnp.zeros_like(h1)
    elif TRAINING and DROPOUT1 > 0.0:
        keep1 = bits_ref[:, :NUM_HIDDENS1] > jnp.uint32(_THRESH1)
        h1 = jnp.where(keep1, h1 * jnp.float32(1.0 / (1.0 - DROPOUT1)), 0.0)

    # ---- layer 2: linear + relu + dropout(p2)
    h2 = jnp.dot(h1.astype(jnp.bfloat16), w2_ref[...],
                 preferred_element_type=jnp.float32) + b2_ref[...]
    h2 = jnp.maximum(h2, 0.0)
    if TRAINING and DROPOUT2 >= 1.0:
        h2 = jnp.zeros_like(h2)
    elif TRAINING and DROPOUT2 > 0.0:
        keep2 = bits_ref[:, NUM_HIDDENS1:] > jnp.uint32(_THRESH2)
        h2 = jnp.where(keep2, h2 * jnp.float32(1.0 / (1.0 - DROPOUT2)), 0.0)

    # ---- layer 3: linear (logits), lane-dense padded output store
    out = jnp.dot(h2.astype(jnp.bfloat16), w3_ref[...],
                  preferred_element_type=jnp.float32) + b3_ref[...]
    out_ref[...] = out.astype(out_ref.dtype)


def _round_up(n, m):
    return ((n + m - 1) // m) * m


def net_forward(x, params, key, *, batch_tile=512):
    """x: any shape whose trailing dims flatten to NUM_INPUTS (like the PyTorch
    reshape((-1, num_inputs))).  `key` drives the dropout masks."""
    x2d = x.reshape(-1, NUM_INPUTS).astype(jnp.float32)
    b = x2d.shape[0]

    tb = min(batch_tile, _round_up(b, 8))       # batch tile (multiple of 8)
    b_pad = _round_up(b, tb)
    if b_pad != b:
        x2d = jnp.pad(x2d, ((0, b_pad - b), (0, 0)))

    w1, b1, w2, b2, w3, b3 = params
    w1 = w1.astype(jnp.bfloat16)
    w2 = w2.astype(jnp.bfloat16)
    w3p = jnp.pad(w3, ((0, 0), (0, OUT_PAD - NUM_OUTPUTS))).astype(jnp.bfloat16)
    b3p = jnp.pad(b3, ((0, 0), (0, OUT_PAD - NUM_OUTPUTS)))

    # Portable dropout randomness: raw uint32 bits, one column block per
    # hidden unit of both dropout layers, tiled along the batch with the grid.
    n_bits_cols = NUM_HIDDENS1 + NUM_HIDDENS2
    bits = jax.random.bits(key, (b_pad, n_bits_cols), dtype=jnp.uint32)

    grid = (b_pad // tb,)
    full = lambda i: (0, 0)

    flops = 2 * b_pad * (NUM_INPUTS * NUM_HIDDENS1
                         + NUM_HIDDENS1 * NUM_HIDDENS2
                         + NUM_HIDDENS2 * OUT_PAD)
    bytes_accessed = (4 * (x2d.size + bits.size + b_pad * OUT_PAD)
                      + 2 * (w1.size + w2.size + w3p.size)
                      + 4 * (b1.size + b2.size + b3p.size))

    out = pl.pallas_call(
        mlp_dropout_kernel,
        out_shape=jax.ShapeDtypeStruct((b_pad, OUT_PAD), jnp.float32),
        grid=grid,
        in_specs=[
            pl.BlockSpec((tb, NUM_INPUTS), lambda i: (i, 0)),          # x tile
            pl.BlockSpec((tb, n_bits_cols), lambda i: (i, 0)),         # rng bits
            pl.BlockSpec((NUM_INPUTS, NUM_HIDDENS1), full),            # w1
            pl.BlockSpec((1, NUM_HIDDENS1), full),                     # b1
            pl.BlockSpec((NUM_HIDDENS1, NUM_HIDDENS2), full),          # w2
            pl.BlockSpec((1, NUM_HIDDENS2), full),                     # b2
            pl.BlockSpec((NUM_HIDDENS2, OUT_PAD), full),               # w3 (padded)
            pl.BlockSpec((1, OUT_PAD), full),                          # b3 (padded)
        ],
        out_specs=pl.BlockSpec((tb, OUT_PAD), lambda i: (i, 0)),
        compiler_params=pltpu.CompilerParams(
            dimension_semantics=("parallel",),
            vmem_limit_bytes=32 * 1024 * 1024,
        ),
        cost_estimate=pl.CostEstimate(flops=flops, transcendentals=0,
                                      bytes_accessed=bytes_accessed),
    )(x2d, bits, w1, b1, w2, b2, w3p, b3p)

    return out[:b, :NUM_OUTPUTS]


def init_params(key):
    """Deterministic init mimicking nn.Linear's U(-1/sqrt(fan_in), 1/sqrt(fan_in))."""
    def linear(key, fan_in, fan_out):
        kw, kb = jax.random.split(key)
        bound = 1.0 / jnp.sqrt(fan_in)
        w = jax.random.uniform(kw, (fan_in, fan_out), jnp.float32, -bound, bound)
        b = jax.random.uniform(kb, (1, fan_out), jnp.float32, -bound, bound)
        return w, b

    k1, k2, k3 = jax.random.split(key, 3)
    w1, b1 = linear(k1, NUM_INPUTS, NUM_HIDDENS1)
    w2, b2 = linear(k2, NUM_HIDDENS1, NUM_HIDDENS2)
    w3, b3 = linear(k3, NUM_HIDDENS2, NUM_OUTPUTS)
    return (w1, b1, w2, b2, w3, b3)


if __name__ == "__main__":
    key = jax.random.PRNGKey(0)
    kp, kx, kd = jax.random.split(key, 3)

    params = init_params(kp)
    # input mimics an image batch that gets flattened: (8, 1, 16, 16) -> (8, 256)
    x = jax.random.normal(kx, (8, 1, 16, 16), dtype=jnp.float32)

    out = net_forward(x, params, kd)
    out = jax.block_until_ready(out)

    assert out.shape == (8, NUM_OUTPUTS)
    assert bool(jnp.all(jnp.isfinite(out)))
    print("KERNEL_OK")
</pallas_src>

<mosaic_0001>
module attributes {stable_mosaic.version = 11 : i64} {
  func.func @mlp_dropout_kernel(%arg0: i32, %arg1: memref<8x256xf32, #tpu.memory_space<vmem>>, %arg2: memref<8x192xi32, #tpu.memory_space<vmem>>, %arg3: memref<256x128xbf16, #tpu.memory_space<vmem>>, %arg4: memref<1x128xf32, #tpu.memory_space<vmem>>, %arg5: memref<128x64xbf16, #tpu.memory_space<vmem>>, %arg6: memref<1x64xf32, #tpu.memory_space<vmem>>, %arg7: memref<64x128xbf16, #tpu.memory_space<vmem>>, %arg8: memref<1x128xf32, #tpu.memory_space<vmem>>, %arg9: memref<8x128xf32, #tpu.memory_space<vmem>>) attributes {dimension_semantics = [#tpu.dimension_semantics<parallel>], iteration_bounds = array<i64: 1>, scalar_prefetch = 0 : i64, scratch_operands = 0 : i64, tpu.core_type = #tpu.core_type<tc>, window_params = [{transform_indices = @transform_0, window_bounds = array<i64: 8, 256>}, {transform_indices = @transform_1, window_bounds = array<i64: 8, 192>}, {pipeline_mode = #tpu.pipeline_mode<synchronous>, transform_indices = @transform_2, window_bounds = array<i64: 256, 128>}, {pipeline_mode = #tpu.pipeline_mode<synchronous>, transform_indices = @transform_3, window_bounds = array<i64: 1, 128>}, {pipeline_mode = #tpu.pipeline_mode<synchronous>, transform_indices = @transform_4, window_bounds = array<i64: 128, 64>}, {pipeline_mode = #tpu.pipeline_mode<synchronous>, transform_indices = @transform_5, window_bounds = array<i64: 1, 64>}, {pipeline_mode = #tpu.pipeline_mode<synchronous>, transform_indices = @transform_6, window_bounds = array<i64: 64, 128>}, {pipeline_mode = #tpu.pipeline_mode<synchronous>, transform_indices = @transform_7, window_bounds = array<i64: 1, 128>}, {transform_indices = @transform_8, window_bounds = array<i64: 8, 128>}]} {
    %c0 = arith.constant 0 : index
    %c0_0 = arith.constant 0 : index
    %0 = vector.load %arg1[%c0, %c0_0] : memref<8x256xf32, #tpu.memory_space<vmem>>, vector<8x256xf32>
    %1 = arith.truncf %0 : vector<8x256xf32> to vector<8x256xbf16>
    %c0_1 = arith.constant 0 : index
    %c0_2 = arith.constant 0 : index
    %2 = vector.load %arg3[%c0_1, %c0_2] : memref<256x128xbf16, #tpu.memory_space<vmem>>, vector<256x128xbf16>
    %cst = arith.constant dense<0.000000e+00> : vector<8x128xf32>
    %3 = tpu.matmul %1, %2, %cst {dimension_numbers = #tpu.dot_dimension_numbers<[1], [0], [0], [1], [0, 0, 1, 1], [], []>} : vector<8x256xbf16>, vector<256x128xbf16>, vector<8x128xf32> -> vector<8x128xf32>
    %c0_3 = arith.constant 0 : index
    %c0_4 = arith.constant 0 : index
    %4 = vector.load %arg4[%c0_3, %c0_4] : memref<1x128xf32, #tpu.memory_space<vmem>>, vector<1x128xf32>
    %5 = vector.broadcast %4 : vector<1x128xf32> to vector<8x128xf32>
    %6 = arith.addf %3, %5 : vector<8x128xf32>
    %cst_5 = arith.constant 0.000000e+00 : f32
    %7 = vector.broadcast %cst_5 : f32 to vector<8x128xf32>
    %8 = arith.maximumf %6, %7 : vector<8x128xf32>
    %c0_6 = arith.constant 0 : index
    %c0_7 = arith.constant 0 : index
    %9 = vector.load %arg2[%c0_6, %c0_7] : memref<8x192xi32, #tpu.memory_space<vmem>>, vector<8x128xi32>
    %c858993459_i32 = arith.constant 858993459 : i32
    %10 = vector.broadcast %c858993459_i32 : i32 to vector<8x128xi32>
    %11 = arith.cmpi ugt, %9, %10 : vector<8x128xi32>
    %cst_8 = arith.constant 1.250000e+00 : f32
    %12 = vector.broadcast %cst_8 : f32 to vector<8x128xf32>
    %13 = arith.mulf %8, %12 : vector<8x128xf32>
    %cst_9 = arith.constant 0.000000e+00 : f32
    %14 = vector.broadcast %cst_9 : f32 to vector<8x128xf32>
    %15 = arith.select %11, %13, %14 : vector<8x128xi1>, vector<8x128xf32>
    %16 = arith.truncf %15 : vector<8x128xf32> to vector<8x128xbf16>
    %c0_10 = arith.constant 0 : index
    %c0_11 = arith.constant 0 : index
    %17 = vector.load %arg5[%c0_10, %c0_11] : memref<128x64xbf16, #tpu.memory_space<vmem>>, vector<128x64xbf16>
    %cst_12 = arith.constant dense<0.000000e+00> : vector<8x64xf32>
    %18 = tpu.matmul %16, %17, %cst_12 {dimension_numbers = #tpu.dot_dimension_numbers<[1], [0], [0], [1], [0, 0, 1, 1], [], []>} : vector<8x128xbf16>, vector<128x64xbf16>, vector<8x64xf32> -> vector<8x64xf32>
    %c0_13 = arith.constant 0 : index
    %c0_14 = arith.constant 0 : index
    %19 = vector.load %arg6[%c0_13, %c0_14] : memref<1x64xf32, #tpu.memory_space<vmem>>, vector<1x64xf32>
    %20 = vector.broadcast %19 : vector<1x64xf32> to vector<8x64xf32>
    %21 = arith.addf %18, %20 : vector<8x64xf32>
    %cst_15 = arith.constant 0.000000e+00 : f32
    %22 = vector.broadcast %cst_15 : f32 to vector<8x64xf32>
    %23 = arith.maximumf %21, %22 : vector<8x64xf32>
    %c0_16 = arith.constant 0 : index
    %c128 = arith.constant 128 : index
    %24 = vector.load %arg2[%c0_16, %c128] : memref<8x192xi32, #tpu.memory_space<vmem>>, vector<8x64xi32>
    %c-2147483648_i32 = arith.constant -2147483648 : i32
    %25 = vector.broadcast %c-2147483648_i32 : i32 to vector<8x64xi32>
    %26 = arith.cmpi ugt, %24, %25 : vector<8x64xi32>
    %cst_17 = arith.constant 2.000000e+00 : f32
    %27 = vector.broadcast %cst_17 : f32 to vector<8x64xf32>
    %28 = arith.mulf %23, %27 : vector<8x64xf32>
    %cst_18 = arith.constant 0.000000e+00 : f32
    %29 = vector.broadcast %cst_18 : f32 to vector<8x64xf32>
    %30 = arith.select %26, %28, %29 : vector<8x64xi1>, vector<8x64xf32>
    %31 = arith.truncf %30 : vector<8x64xf32> to vector<8x64xbf16>
    %c0_19 = arith.constant 0 : index
    %c0_20 = arith.constant 0 : index
    %32 = vector.load %arg7[%c0_19, %c0_20] : memref<64x128xbf16, #tpu.memory_space<vmem>>, vector<64x128xbf16>
    %cst_21 = arith.constant dense<0.000000e+00> : vector<8x128xf32>
    %33 = tpu.matmul %31, %32, %cst_21 {dimension_numbers = #tpu.dot_dimension_numbers<[1], [0], [0], [1], [0, 0, 1, 1], [], []>} : vector<8x64xbf16>, vector<64x128xbf16>, vector<8x128xf32> -> vector<8x128xf32>
    %c0_22 = arith.constant 0 : index
    %c0_23 = arith.constant 0 : index
    %34 = vector.load %arg8[%c0_22, %c0_23] : memref<1x128xf32, #tpu.memory_space<vmem>>, vector<1x128xf32>
    %35 = vector.broadcast %34 : vector<1x128xf32> to vector<8x128xf32>
    %36 = arith.addf %33, %35 : vector<8x128xf32>
    %c0_24 = arith.constant 0 : index
    %c0_25 = arith.constant 0 : index
    %37 = vector.load %arg9[%c0_24, %c0_25] : memref<8x128xf32, #tpu.memory_space<vmem>>, vector<8x128xf32>
    tpu.vector_store %arg9[%c0_24, %c0_25], %36 {strides = array<i32>} : memref<8x128xf32, #tpu.memory_space<vmem>>, vector<8x128xf32>,
    return
  }
  func.func @transform_0(%arg0: i32) -> (i32, i32) {
    %c0_i32 = arith.constant 0 : i32
    %c0_i32_0 = arith.constant 0 : i32
    return %arg0, %c0_i32 : i32, i32
  }
  func.func @transform_1(%arg0: i32) -> (i32, i32) {
    %c0_i32 = arith.constant 0 : i32
    %c0_i32_0 = arith.constant 0 : i32
    return %arg0, %c0_i32 : i32, i32
  }
  func.func @transform_2(%arg0: i32) -> (i32, i32) {
    %c0_i32 = arith.constant 0 : i32
    %c0_i32_0 = arith.constant 0 : i32
    %c0_i32_1 = arith.constant 0 : i32
    return %c0_i32, %c0_i32_0 : i32, i32
  }
  func.func @transform_3(%arg0: i32) -> (i32, i32) {
    %c0_i32 = arith.constant 0 : i32
    %c0_i32_0 = arith.constant 0 : i32
    %c0_i32_1 = arith.constant 0 : i32
    return %c0_i32, %c0_i32_0 : i32, i32
  }
  func.func @transform_4(%arg0: i32) -> (i32, i32) {
    %c0_i32 = arith.constant 0 : i32
    %c0_i32_0 = arith.constant 0 : i32
    %c0_i32_1 = arith.constant 0 : i32
    return %c0_i32, %c0_i32_0 : i32, i32
  }
  func.func @transform_5(%arg0: i32) -> (i32, i32) {
    %c0_i32 = arith.constant 0 : i32
    %c0_i32_0 = arith.constant 0 : i32
    %c0_i32_1 = arith.constant 0 : i32
    return %c0_i32, %c0_i32_0 : i32, i32
  }
  func.func @transform_6(%arg0: i32) -> (i32, i32) {
    %c0_i32 = arith.constant 0 : i32
    %c0_i32_0 = arith.constant 0 : i32
    %c0_i32_1 = arith.constant 0 : i32
    return %c0_i32, %c0_i32_0 : i32, i32
  }
  func.func @transform_7(%arg0: i32) -> (i32, i32) {
    %c0_i32 = arith.constant 0 : i32
    %c0_i32_0 = arith.constant 0 : i32
    %c0_i32_1 = arith.constant 0 : i32
    return %c0_i32, %c0_i32_0 : i32, i32
  }
  func.func @transform_8(%arg0: i32) -> (i32, i32) {
    %c0_i32 = arith.constant 0 : i32
    %c0_i32_0 = arith.constant 0 : i32
    return %arg0, %c0_i32 : i32, i32
  }
}

</mosaic_0001>

<bundles_post_ra>
// kernel: tpu_custom_call.1
= control target key start
LH: loop header
LB: loop body
LE: loop exit
PB: predicated region body
PF: predicated region fallthrough
CT: control target
= control target key end

     0   :  { %13 = vsyncpa [#allocation3], 0  ;;  %s777_s0 = inlined_call_operand.vmem [shape: f32[8,256], index: 0, kind: input, shape index: {}]   ;;  %s778_s1 = inlined_call_operand.vmem [shape: u32[8,192], index: 1, kind: input, shape index: {}]   ;;  %s779_s2 = inlined_call_operand.hbm [shape: bf16[256,128], index: 2, kind: input, shape index: {}]   ;;  %s780_s3 = inlined_call_operand.vmem [shape: f32[1,128], index: 3, kind: input, shape index: {}]   ;;  %s781_s4 = inlined_call_operand.vmem [shape: bf16[128,64], index: 4, kind: input, shape index: {}]   ;;  %s782_s5 = inlined_call_operand.vmem [shape: f32[1,64], index: 5, kind: input, shape index: {}]   ;;  %s783_s6 = inlined_call_operand.vmem [shape: bf16[64,128], index: 6, kind: input, shape index: {}]   ;;  %s784_s7 = inlined_call_operand.vmem [shape: f32[1,128], index: 7, kind: input, shape index: {}]   ;;  %s785_s8 = inlined_call_operand.hbm [shape: f32[8,128], index: 8, kind: output, shape index: {}]  }
   0x1   :  { %14 = vsyncpa [#allocation4], 0  ;;  %s631_s27 = smov [#allocation2]   ;;  %s583_s9 = scalar_lea.hbm %s779_s2, 2048 }
   0x2   :  { %s24_s28 = sshll.u32 %s631_s27, 4  ;;  %p584_p0 = scmp.ne.s32.totalorder %s779_s2, %s583_s9  ;;  %s25_s28 = int_to_ptr.vmem [resolvable:$true] %s24_s28 }
   0x3   :  { %p587_p1 = scmp.lt.u32.totalorder %s583_s9, %s779_s2 }
   0x5   :  { %p589_p2 = pnand %p587_p1, %p584_p0 }
   0x7   :  { %592 = shalt.err (!%p589_p2)
}
   0x8   :  { %s593_s14 = scalar_lea.vmem %s25_s28, 2048  ;;  %p598_p4 = scmp.lt.s32.totalorder %s25_s28, %s25_s28 }
   0x9   :  { %p594_p3 = scmp.ne.s32.totalorder %s25_s28, %s593_s14  ;;  %p599_p5 = scmp.lt.s32.totalorder %s593_s14, %s593_s14 }
   0xb   :  { %p600_p6 = por %p599_p5, %p598_p4 }
   0xd   :  { %p601_p7 = pnand %p600_p6, %p594_p3 }
   0xf   :  { %604 = shalt.err (!%p601_p7)
}
  0x10   :  { %s632_s15 = smov 64   ;;  %s633_s16 = smov 4  }
  0x11   :  { %30 = dma.hbm_to_vmem [thread:$0]  %s779_s2, 2048, %s25_s28, [#allocation3], %s632_s15, %s632_s15, %s633_s16  }
  0x12   :  { %627 = dma.done.wait [#allocation3], 2048  }
  0x13   :  { %628 = vsyncadd [#allocation3], 4294965248  ;;  %v634_v0 = vmov 0.0   ;;  %v555_v1 = vld [vmem:[#allocation2 + $0x40] sm:$0xff]   ;;  %v557_v3 = vld [vmem:[#allocation2 + $0x48] sm:$0xff]   ;;  %vm635_vm0 = vmmov 0  }
  0x14   :  { %517 = vmatprep.subr.bf16.mxu1 %v634_v0  ;;  %v556_v2 = vld [vmem:[#allocation2] sm:$0xff]   ;;  %481 = vmatprep.subr.bf16.mxu0 %v555_v1  ;;  %v558_v4 = vld [vmem:[#allocation2 + $0x8] sm:$0xff]   ;;  %v559_v5 = vld [vmem:[#allocation2 + $0x50] sm:$0xff]   ;;  %vm386_vm4 = vcmask 523264  }
  0x15   :  { %482 = vmatpush3.bf16.msra.mxu0 %v556_v2  ;;  %v560_v6 = vld [vmem:[#allocation2 + $0x10] sm:$0xff]   ;;  %v561_v7 = vld [vmem:[#allocation2 + $0x58] sm:$0xff]   ;;  %v563_v9 = vld [vmem:[#allocation2 + $0x60] sm:$0xff]   ;;  %533 = vmatprep.mubr.msk.bf16.mxu1 %vm635_vm0, %v634_v0 }
  0x16   :  { %483 = vmatprep.subr.bf16.mxu0 %v557_v3  ;;  %v562_v8 = vld [vmem:[#allocation2 + $0x18] sm:$0xff]   ;;  %v564_v10 = vld [vmem:[#allocation2 + $0x20] sm:$0xff]   ;;  %v565_v11 = vld [vmem:[#allocation2 + $0x68] sm:$0xff]  }
  0x17   :  { %v46_v12 = vld [vmem:[%s777_s0 + $0x8] sm:$0xff]  ;;  %v571_v14 = vld [vmem:[%s781_s4] sm:$0xff]   ;;  %v567_v16 = vld [vmem:[#allocation2 + $0x70] sm:$0xff]  }
  0x18   :  { %v48_v13 = vpack.c.bf16 %v46_v12, %v46_v12  ;;  %v566_v15 = vld [vmem:[#allocation2 + $0x28] sm:$0xff]   ;;  %518 = vmatpush3.bf16.msra.mxu1 %v571_v14  ;;  %v568_v18 = vld [vmem:[#allocation2 + $0x30] sm:$0xff]   ;;  %v569_v19 = vld [vmem:[#allocation2 + $0x78] sm:$0xff]  }
  0x19   :  { %484 = vmatpush3.bf16.msra.mxu0 %v558_v4  ;;  %v572_v17 = vld [vmem:[%s781_s4 + $0x8] sm:$0xff]   ;;  %519 = vmatprep.subr.bf16.mxu1 %v634_v0  ;;  %v573_v20 = vld [vmem:[%s781_s4 + $0x10] sm:$0xff]   ;;  %v570_v21 = vld [vmem:[#allocation2 + $0x38] sm:$0xff]  }
  0x1a   :  { %485 = vmatprep.subr.bf16.mxu0 %v559_v5  ;;  %216 = vmatprep.mubr.bf16.mxu0 %v48_v13  ;;  %v45_v22 = vld [vmem:[%s777_s0] sm:$0xff]  ;;  %v574_v23 = vld [vmem:[%s781_s4 + $0x18] sm:$0xff]   ;;  %v576_v26 = vld [vmem:[%s781_s4 + $0x28] sm:$0xff]  }
  0x1b   :  { %v47_v24 = vpack.c.bf16 %v45_v22, %v45_v22  ;;  %v575_v25 = vld [vmem:[%s781_s4 + $0x20] sm:$0xff]   ;;  %v577_v27 = vld [vmem:[%s781_s4 + $0x30] sm:$0xff]   ;;  %v578_v28 = vld [vmem:[%s781_s4 + $0x38] sm:$0xff]  }
  0x1c   :  { %520 = vmatpush3.bf16.msra.mxu1 %v572_v17  ;;  %v579_v29 = vld [vmem:[%s783_s6] sm:$0xff]   ;;  %v580_v30 = vld [vmem:[%s783_s6 + $0x8] sm:$0xff]   ;;  %v581_v42 = vld [vmem:[%s783_s6 + $0x10] sm:$0xff]  }
  0x1d   :  { %486 = vmatpush3.bf16.msra.mxu0 %v560_v6  ;;  %521 = vmatprep.subr.bf16.mxu1 %v634_v0  ;;  %v446_v32 = vld [vmem:[%s780_s3] ss:$0 sm:$0xff]  ;;  %v582_v43 = vld [vmem:[%s783_s6 + $0x18] sm:$0xff]   ;;  %v342_v47 = vld [vmem:[%s778_s1 + $0x8] sm:$0xff] }
  0x1e   :  { %487 = vmatprep.subr.bf16.mxu0 %v561_v7  ;;  %v225_v37 = vld [vmem:[%s778_s1] sm:$0xff]  ;;  %vm343_vm3 = vcmp.gt.u32.totalorder %v342_v47, 2147483648 }
  0x1f   :  { %vm226_vm1 = vcmp.gt.u32.totalorder %v225_v37, 858993459  ;;  %v463_v44 = vld [vmem:[%s782_s5] ss:$0 sm:$0xff]  ;;  %s636_s5 = smov [#allocation5]  }
  0x20   :  { %522 = vmatpush3.bf16.msra.mxu1 %v573_v20  ;;  %vm472_vm2 = vmpackc.low %vm226_vm1, %vm226_vm1  ;;  %v475_v55 = vld [vmem:[%s784_s7] ss:$0 sm:$0xff]  ;;  %s437_s29 = sshll.u32 %s636_s5, 4  ;;  %s438_s29 = int_to_ptr.vmem [resolvable:$true] %s437_s29 }
  0x21   :  { %488 = vmatpush3.bf16.msra.mxu0 %v562_v8  ;;  %523 = vmatprep.subr.bf16.mxu1 %v634_v0  ;;  %s605_s1 = scalar_lea.vmem %s438_s29, 128  ;;  %p610_p9 = scmp.lt.s32.totalorder %s438_s29, %s438_s29 }
  0x22   :  { %489 = vmatprep.subr.bf16.mxu0 %v563_v9  ;;  %p606_p8 = scmp.ne.s32.totalorder %s438_s29, %s605_s1  ;;  %p611_p10 = scmp.lt.s32.totalorder %s605_s1, %s605_s1 }
  0x24   :  { %524 = vmatpush3.bf16.msra.mxu1 %v574_v23  ;;  %p612_p11 = por %p611_p10, %p610_p9 }
  0x25   :  { %490 = vmatpush3.bf16.msra.mxu0 %v564_v10  ;;  %525 = vmatprep.subr.bf16.mxu1 %v634_v0 }
  0x26   :  { %491 = vmatprep.subr.bf16.mxu0 %v565_v11  ;;  %p613_p12 = pnand %p612_p11, %p606_p8 }
  0x28   :  { %526 = vmatpush3.bf16.msra.mxu1 %v575_v25 }
  0x29   :  { %492 = vmatpush3.bf16.msra.mxu0 %v566_v15  ;;  %527 = vmatprep.subr.bf16.mxu1 %v634_v0 }
  0x2a   :  { %493 = vmatprep.subr.bf16.mxu0 %v567_v16 }
  0x2c   :  { %528 = vmatpush3.bf16.msra.mxu1 %v576_v26 }
  0x2d   :  { %494 = vmatpush3.bf16.msra.mxu0 %v568_v18  ;;  %529 = vmatprep.subr.bf16.mxu1 %v634_v0 }
  0x2e   :  { %495 = vmatprep.subr.bf16.mxu0 %v569_v19 }
  0x30   :  { %530 = vmatpush3.bf16.msra.mxu1 %v577_v27 }
  0x31   :  { %496 = vmatpush3.bf16.msra.mxu0 %v570_v21  ;;  %531 = vmatprep.subr.bf16.mxu1 %v634_v0 }
  0x32   :  { %537 = vmatprep.subr.bf16.mxu0 %v634_v0 }
  0x34   :  { %217 = vmatmul.mubr.bf16.vlgmr.msra.gmra.mrb[0].mxu0 %v47_v24  ;;  %532 = vmatpush3.bf16.msra.mxu1 %v578_v28 }
  0x35   :  { %545 = vmatprep.mubr.msk.bf16.mxu0 %vm635_vm0, %v634_v0  ;;  %538 = vmatpush3.bf16.msra.mxu0 %v579_v29 }
  0x36   :  { %539 = vmatprep.subr.bf16.mxu0 %v634_v0 }
  0x39   :  { %540 = vmatpush3.bf16.msra.mxu0 %v580_v30 }
  0x3a   :  { %541 = vmatprep.subr.bf16.mxu0 %v634_v0 }
  0x3d   :  { %542 = vmatpush3.bf16.msra.mxu0 %v581_v42 }
  0x3e   :  { %543 = vmatprep.subr.bf16.mxu0 %v634_v0 }
  0x41   :  { %544 = vmatpush3.bf16.msra.mxu0 %v582_v43 }
 0x107   :  { %v497_v31 = vpop.f32.mrb[0].mxu0 }
 0x108   :  { %v498_v33 = vpop.f32.mrb[1].mxu0 }
 0x109   :  { %v499_v34 = vadd.f32 %v498_v33, %v497_v31  ;;  %v500_v35 = vpop.f32.mrb[2].mxu0 }
 0x10a   :  { %v501_v36 = vpop.f32.mrb[3].mxu0 }
 0x10b   :  { %v219_v38 = vadd.f32 %v499_v34, %v446_v32 }
 0x10d   :  { %v224_v39 = vmax.f32 %v219_v38, 0.0 }
 0x10f   :  { %v227_v40 = vmul.f32 1.25, %v224_v39 }
 0x111   :  { %v473_v41 = vpack.c.bf16 %v227_v40, %v227_v40 }
 0x113   :  { %534 = vmatmul.mubr.msk.bf16.vlgmr.msra.gmra.mrb[0].mxu1 %vm472_vm2, %v473_v41 }
 0x1e6   :  { %v335_v45 = vpop.f32.mrb[0].mxu1 }
 0x1e7   :  { %v336_v46 = vadd.f32 %v463_v44, %v335_v45  ;;  %v535_v48 = vpop.f32.mrb[1].mxu1 }
 0x1e8   :  { %v338_v49 = vpop.f32.mrb[2].mxu1 }
 0x1e9   :  { %v341_v50 = vmax.f32 %v336_v46, 0.0  ;;  %v536_v51 = vpop.f32.mrb[3].mxu1 }
 0x1eb   :  { %v344_v52 = vmul.f32 2.0, %v341_v50 }
 0x1ed   :  { %v345_v53 = vsel %vm343_vm3, %v344_v52, 0.0 }
 0x1ee   :  { %v346_v54 = vpack.c.bf16 %v345_v53, %v345_v53 }
 0x1f0   :  { %546 = vmatmul.mubr.msk.bf16.vlgmr.msra.gmra.mrb[4].mxu0 %vm386_vm4, %v346_v54 }
 0x2c3   :  { %v424_v56 = vpop.f32.mrb[4].mxu0 }
 0x2c4   :  { %v425_v57 = vadd.f32 %v475_v55, %v424_v56  ;;  %v547_v58 = vpop.f32.mrb[5].mxu0 }
 0x2c5   :  { %v427_v59 = vpop.f32.mrb[6].mxu0 }
 0x2c6   :  { %430 = vst [vmem:[#allocation5] sm:$0xff] %v425_v57  ;;  %v548_v60 = vpop.f32.mrb[7].mxu0 }
 0x2c7   :  { %616 = shalt.err (!%p613_p12)
}
 0x2c8   :  { %s617_s7 = scalar_lea.hbm %s785_s8, 128 }
 0x2c9   :  { %p618_p13 = scmp.ne.s32.totalorder %s785_s8, %s617_s7  ;;  %p621_p0 = scmp.lt.u32.totalorder %s617_s7, %s785_s8 }
 0x2cb   :  { %p623_p1 = pnand %p621_p0, %p618_p13 }
 0x2cd   :  { %626 = shalt.err (!%p623_p1)
}
 0x2ce   :  { %440 = dma.vmem_to_hbm [thread:$0]  %s438_s29, 128, %s785_s8, [#allocation4]  }
 0x2cf   :  { %629 = dma.done.wait [#allocation4], 128  }
 0x2d0   :  { %630 = vsyncadd [#allocation4], 4294967168 }
 0x2d1   :  { %444 = vsyncpa [#allocation3], 1 }
 0x2d2   :  { %445 = vsyncpa [#allocation4], 1 }

</bundles_post_ra>
